<compile_context>
chip_gen: v5e
topology: v5e:2x2
jax: 0.10.0
libtpu: 0.0.40
codegen_flags: <defaults>
</compile_context>

<pallas_src>
import functools

import jax
import jax.numpy as jnp
from jax import lax
from jax.experimental import pallas as pl
from jax.experimental.pallas import tpu as pltpu

VOCAB_SIZE = 6
PADDING_IDX = 4


def rnn_classifier_kernel(seq_ref, p_ref, whh_t_ref, wro_ref, bro_ref, out_ref, *, T, B):
    """Whole-batch forward pass in one grid step.

    seq_ref   (T*B, 1)   int32, time-major flat token ids (row = t*B + b)
    p_ref     (V, H)     fused table: emb @ W_ih^T + (b_ih + b_hh)
    whh_t_ref (H, H)     W_hh^T (pre-transposed on host)
    wro_ref   (H, 128)   W_readout^T zero-padded to lane width
    bro_ref   (1, 128)   b_readout zero-padded to lane width
    out_ref   (B, 128)   lane-dense logits block (cols O..127 are padding)
    """
    seq = seq_ref[...]                                       # (T*B, 1) int32
    V, H = p_ref.shape

    # One-hot gather of the entire sequence as a single MXU matmul:
    #   x_proj[t*B + b] = P[seq[b, t]]                       -> (T*B, H), time-major
    onehot = (seq == lax.broadcasted_iota(jnp.int32, (T * B, V), 1)).astype(jnp.float32)
    x_proj = jnp.dot(onehot, p_ref[...], preferred_element_type=jnp.float32)

    # Trailing-padding validity mask, already in the flat time-major layout:
    # step t updates row b iff seq[b, t] != PADDING_IDX  (== t < len[b] for trailing pad).
    valid = seq != PADDING_IDX                               # (T*B, 1) bool

    whh_t = whh_t_ref[...]                                   # (H, H)

    # Serial recurrence, statically unrolled (T is small & static); per-step inputs are
    # static row slices of the 2-D time-major buffers.
    h = jnp.zeros((B, H), jnp.float32)
    for t in range(T):
        r = t * B
        h_new = jnp.tanh(x_proj[r:r + B, :] +
                         jnp.dot(h, whh_t, preferred_element_type=jnp.float32))
        h = jnp.where(valid[r:r + B, :], h_new, h)           # freeze h past each seq end

    # Lane-dense readout store (unmasked vst; wrapper slices off the padded lanes).
    out_ref[...] = (jnp.dot(h, wro_ref[...], preferred_element_type=jnp.float32)
                    + bro_ref[...])


def rnn_classifier_forward(seq, emb, wih, bih, whh, bhh, wro, bro):
    """Wrapper: one-off XLA-side weight prep + a single-grid-step pallas_call."""
    B, T = seq.shape
    V, _E = emb.shape
    H = whh.shape[0]
    O = wro.shape[0]
    LANES = 128
    O_pad = ((O + LANES - 1) // LANES) * LANES               # lane-dense output width

    # Host/XLA-side prep (tiny, one-off): fused embedding+input-projection table,
    # pre-transposed recurrent / readout weights, lane-padded readout, and the
    # time-major flattened token ids.
    p_tbl = (jnp.asarray(emb, jnp.float32) @ jnp.asarray(wih, jnp.float32).T
             + jnp.asarray(bih, jnp.float32) + jnp.asarray(bhh, jnp.float32))   # (V, H)
    whh_t = jnp.asarray(whh, jnp.float32).T                                      # (H, H)
    wro_t = jnp.zeros((H, O_pad), jnp.float32).at[:, :O].set(
        jnp.asarray(wro, jnp.float32).T)                                         # (H, 128)
    bro_p = jnp.zeros((1, O_pad), jnp.float32).at[:, :O].set(
        jnp.asarray(bro, jnp.float32).reshape(1, O))                             # (1, 128)
    seq_flat = jnp.asarray(seq, jnp.int32).T.reshape(T * B, 1)                   # (T*B, 1)

    kernel = functools.partial(rnn_classifier_kernel, T=T, B=B)

    out_pad = pl.pallas_call(
        kernel,
        out_shape=jax.ShapeDtypeStruct((B, O_pad), jnp.float32),
        grid=(1,),
        in_specs=[pl.BlockSpec((T * B, 1), lambda i: (0, 0)),
                  pl.BlockSpec((V, H), lambda i: (0, 0)),
                  pl.BlockSpec((H, H), lambda i: (0, 0)),
                  pl.BlockSpec((H, O_pad), lambda i: (0, 0)),
                  pl.BlockSpec((1, O_pad), lambda i: (0, 0))],
        out_specs=pl.BlockSpec((B, O_pad), lambda i: (0, 0)),
        compiler_params=pltpu.CompilerParams(
            dimension_semantics=("arbitrary",)),
    )(seq_flat, p_tbl, whh_t, wro_t, bro_p)

    return out_pad[:, :O]


def reference_forward(seq, emb, wih, bih, whh, bhh, wro, bro):
    # Pure-JAX reference mirroring PyTorch semantics (trailing padding).
    B, T = seq.shape
    H = whh.shape[0]
    lens = jnp.sum((seq != PADDING_IDX).astype(jnp.int32), axis=-1)      # (B,)
    x = emb[seq]                                                          # (B, T, E)
    h = jnp.zeros((B, H), jnp.float32)
    for t in range(T):
        h_new = jnp.tanh(x[:, t, :] @ wih.T + bih[0] + h @ whh.T + bhh[0])
        h = jnp.where((t < lens)[:, None], h_new, h)
    return h @ wro.T + bro[0]


if __name__ == "__main__":
    # Small shapes consistent with the module's forward.
    B, T = 2, 8
    E, H = 5, 32
    MAX_ARG = 10
    O = MAX_ARG + 1

    key = jax.random.PRNGKey(0)
    k_emb, k_wih, k_bih, k_whh, k_bhh, k_wro, k_bro, k_tok = jax.random.split(key, 8)

    emb = jax.random.normal(k_emb, (VOCAB_SIZE, E), jnp.float32) * 0.5
    wih = jax.random.normal(k_wih, (H, E), jnp.float32) * 0.3
    bih = jax.random.normal(k_bih, (1, H), jnp.float32) * 0.1
    whh = jax.random.normal(k_whh, (H, H), jnp.float32) * 0.3
    bhh = jax.random.normal(k_bhh, (1, H), jnp.float32) * 0.1
    wro = jax.random.normal(k_wro, (O, H), jnp.float32) * 0.3
    bro = jax.random.normal(k_bro, (1, O), jnp.float32) * 0.1

    # (B, T) int32 input: non-padding tokens followed by trailing padding.
    lengths = jnp.array([8, 5], dtype=jnp.int32)
    tokens = jax.random.randint(k_tok, (B, T), 0, PADDING_IDX, dtype=jnp.int32)  # tokens 0..3
    pos = jnp.arange(T, dtype=jnp.int32)[None, :]
    input_seq = jnp.where(pos < lengths[:, None], tokens, PADDING_IDX)

    logits = rnn_classifier_forward(input_seq, emb, wih, bih, whh, bhh, wro, bro)
    jax.block_until_ready(logits)

    ref = reference_forward(input_seq, emb, wih, bih, whh, bhh, wro, bro)
    assert logits.shape == (B, O)
    assert jnp.allclose(logits, ref, atol=1e-4, rtol=1e-4), "mismatch vs reference"

    print("KERNEL_OK")
</pallas_src>

<mosaic_0001>
module attributes {stable_mosaic.version = 11 : i64} {
  func.func @rnn_classifier_kernel(%arg0: i32, %arg1: memref<16x1xi32, #tpu.memory_space<vmem>>, %arg2: memref<6x32xf32, #tpu.memory_space<vmem>>, %arg3: memref<32x32xf32, #tpu.memory_space<vmem>>, %arg4: memref<32x128xf32, #tpu.memory_space<vmem>>, %arg5: memref<1x128xf32, #tpu.memory_space<vmem>>, %arg6: memref<2x128xf32, #tpu.memory_space<vmem>>) attributes {dimension_semantics = [#tpu.dimension_semantics<arbitrary>], iteration_bounds = array<i64: 1>, scalar_prefetch = 0 : i64, scratch_operands = 0 : i64, tpu.core_type = #tpu.core_type<tc>, window_params = [{pipeline_mode = #tpu.pipeline_mode<synchronous>, transform_indices = @transform_0, window_bounds = array<i64: 16, 1>}, {pipeline_mode = #tpu.pipeline_mode<synchronous>, transform_indices = @transform_1, window_bounds = array<i64: 6, 32>}, {pipeline_mode = #tpu.pipeline_mode<synchronous>, transform_indices = @transform_2, window_bounds = array<i64: 32, 32>}, {pipeline_mode = #tpu.pipeline_mode<synchronous>, transform_indices = @transform_3, window_bounds = array<i64: 32, 128>}, {pipeline_mode = #tpu.pipeline_mode<synchronous>, transform_indices = @transform_4, window_bounds = array<i64: 1, 128>}, {pipeline_mode = #tpu.pipeline_mode<synchronous>, transform_indices = @transform_5, window_bounds = array<i64: 2, 128>}]} {
    %c0 = arith.constant 0 : index
    %c0_0 = arith.constant 0 : index
    %0 = vector.load %arg1[%c0, %c0_0] : memref<16x1xi32, #tpu.memory_space<vmem>>, vector<16x1xi32>
    %1 = tpu.iota {dimensions = array<i32: 1>} : vector<16x6xi32>
    %2 = vector.broadcast %0 : vector<16x1xi32> to vector<16x6xi32>
    %3 = arith.cmpi eq, %2, %1 : vector<16x6xi32>
    %4 = arith.extui %3 : vector<16x6xi1> to vector<16x6xi32>
    %5 = arith.sitofp %4 : vector<16x6xi32> to vector<16x6xf32>
    %c0_1 = arith.constant 0 : index
    %c0_2 = arith.constant 0 : index
    %6 = vector.load %arg2[%c0_1, %c0_2] : memref<6x32xf32, #tpu.memory_space<vmem>>, vector<6x32xf32>
    %cst = arith.constant dense<0.000000e+00> : vector<16x32xf32>
    %7 = tpu.matmul %5, %6, %cst {dimension_numbers = #tpu.dot_dimension_numbers<[1], [0], [0], [1], [0, 0, 1, 1], [], []>} : vector<16x6xf32>, vector<6x32xf32>, vector<16x32xf32> -> vector<16x32xf32>
    %c4_i32 = arith.constant 4 : i32
    %8 = vector.broadcast %c4_i32 : i32 to vector<16x1xi32>
    %9 = arith.cmpi ne, %0, %8 : vector<16x1xi32>
    %c0_3 = arith.constant 0 : index
    %c0_4 = arith.constant 0 : index
    %10 = vector.load %arg3[%c0_3, %c0_4] : memref<32x32xf32, #tpu.memory_space<vmem>>, vector<32x32xf32>
    %cst_5 = arith.constant 0.000000e+00 : f32
    %11 = vector.broadcast %cst_5 : f32 to vector<2x32xf32>
    %12 = vector.extract_strided_slice %7 {offsets = [0, 0], sizes = [2, 32], strides = [1, 1]} : vector<16x32xf32> to vector<2x32xf32>
    %cst_6 = arith.constant dense<0.000000e+00> : vector<2x32xf32>
    %13 = tpu.matmul %11, %10, %cst_6 {dimension_numbers = #tpu.dot_dimension_numbers<[1], [0], [0], [1], [0, 0, 1, 1], [], []>} : vector<2x32xf32>, vector<32x32xf32>, vector<2x32xf32> -> vector<2x32xf32>
    %14 = arith.addf %12, %13 : vector<2x32xf32>
    %15 = math.tanh %14 : vector<2x32xf32>
    %16 = vector.extract_strided_slice %9 {offsets = [0, 0], sizes = [2, 1], strides = [1, 1]} : vector<16x1xi1> to vector<2x1xi1>
    %17 = vector.shape_cast %16 : vector<2x1xi1> to vector<2x1xi1>
    %18 = vector.broadcast %17 : vector<2x1xi1> to vector<2x32xi1>
    %19 = arith.select %18, %15, %11 : vector<2x32xi1>, vector<2x32xf32>
    %20 = vector.extract_strided_slice %7 {offsets = [2, 0], sizes = [2, 32], strides = [1, 1]} : vector<16x32xf32> to vector<2x32xf32>
    %cst_7 = arith.constant dense<0.000000e+00> : vector<2x32xf32>
    %21 = tpu.matmul %19, %10, %cst_7 {dimension_numbers = #tpu.dot_dimension_numbers<[1], [0], [0], [1], [0, 0, 1, 1], [], []>} : vector<2x32xf32>, vector<32x32xf32>, vector<2x32xf32> -> vector<2x32xf32>
    %22 = arith.addf %20, %21 : vector<2x32xf32>
    %23 = math.tanh %22 : vector<2x32xf32>
    %24 = vector.extract_strided_slice %9 {offsets = [2, 0], sizes = [2, 1], strides = [1, 1]} : vector<16x1xi1> to vector<2x1xi1>
    %25 = vector.shape_cast %24 : vector<2x1xi1> to vector<2x1xi1>
    %26 = vector.broadcast %25 : vector<2x1xi1> to vector<2x32xi1>
    %27 = arith.select %26, %23, %19 : vector<2x32xi1>, vector<2x32xf32>
    %28 = vector.extract_strided_slice %7 {offsets = [4, 0], sizes = [2, 32], strides = [1, 1]} : vector<16x32xf32> to vector<2x32xf32>
    %cst_8 = arith.constant dense<0.000000e+00> : vector<2x32xf32>
    %29 = tpu.matmul %27, %10, %cst_8 {dimension_numbers = #tpu.dot_dimension_numbers<[1], [0], [0], [1], [0, 0, 1, 1], [], []>} : vector<2x32xf32>, vector<32x32xf32>, vector<2x32xf32> -> vector<2x32xf32>
    %30 = arith.addf %28, %29 : vector<2x32xf32>
    %31 = math.tanh %30 : vector<2x32xf32>
    %32 = vector.extract_strided_slice %9 {offsets = [4, 0], sizes = [2, 1], strides = [1, 1]} : vector<16x1xi1> to vector<2x1xi1>
    %33 = vector.shape_cast %32 : vector<2x1xi1> to vector<2x1xi1>
    %34 = vector.broadcast %33 : vector<2x1xi1> to vector<2x32xi1>
    %35 = arith.select %34, %31, %27 : vector<2x32xi1>, vector<2x32xf32>
    %36 = vector.extract_strided_slice %7 {offsets = [6, 0], sizes = [2, 32], strides = [1, 1]} : vector<16x32xf32> to vector<2x32xf32>
    %cst_9 = arith.constant dense<0.000000e+00> : vector<2x32xf32>
    %37 = tpu.matmul %35, %10, %cst_9 {dimension_numbers = #tpu.dot_dimension_numbers<[1], [0], [0], [1], [0, 0, 1, 1], [], []>} : vector<2x32xf32>, vector<32x32xf32>, vector<2x32xf32> -> vector<2x32xf32>
    %38 = arith.addf %36, %37 : vector<2x32xf32>
    %39 = math.tanh %38 : vector<2x32xf32>
    %40 = vector.extract_strided_slice %9 {offsets = [6, 0], sizes = [2, 1], strides = [1, 1]} : vector<16x1xi1> to vector<2x1xi1>
    %41 = vector.shape_cast %40 : vector<2x1xi1> to vector<2x1xi1>
    %42 = vector.broadcast %41 : vector<2x1xi1> to vector<2x32xi1>
    %43 = arith.select %42, %39, %35 : vector<2x32xi1>, vector<2x32xf32>
    %44 = vector.extract_strided_slice %7 {offsets = [8, 0], sizes = [2, 32], strides = [1, 1]} : vector<16x32xf32> to vector<2x32xf32>
    %cst_10 = arith.constant dense<0.000000e+00> : vector<2x32xf32>
    %45 = tpu.matmul %43, %10, %cst_10 {dimension_numbers = #tpu.dot_dimension_numbers<[1], [0], [0], [1], [0, 0, 1, 1], [], []>} : vector<2x32xf32>, vector<32x32xf32>, vector<2x32xf32> -> vector<2x32xf32>
    %46 = arith.addf %44, %45 : vector<2x32xf32>
    %47 = math.tanh %46 : vector<2x32xf32>
    %48 = vector.extract_strided_slice %9 {offsets = [8, 0], sizes = [2, 1], strides = [1, 1]} : vector<16x1xi1> to vector<2x1xi1>
    %49 = vector.shape_cast %48 : vector<2x1xi1> to vector<2x1xi1>
    %50 = vector.broadcast %49 : vector<2x1xi1> to vector<2x32xi1>
    %51 = arith.select %50, %47, %43 : vector<2x32xi1>, vector<2x32xf32>
    %52 = vector.extract_strided_slice %7 {offsets = [10, 0], sizes = [2, 32], strides = [1, 1]} : vector<16x32xf32> to vector<2x32xf32>
    %cst_11 = arith.constant dense<0.000000e+00> : vector<2x32xf32>
    %53 = tpu.matmul %51, %10, %cst_11 {dimension_numbers = #tpu.dot_dimension_numbers<[1], [0], [0], [1], [0, 0, 1, 1], [], []>} : vector<2x32xf32>, vector<32x32xf32>, vector<2x32xf32> -> vector<2x32xf32>
    %54 = arith.addf %52, %53 : vector<2x32xf32>
    %55 = math.tanh %54 : vector<2x32xf32>
    %56 = vector.extract_strided_slice %9 {offsets = [10, 0], sizes = [2, 1], strides = [1, 1]} : vector<16x1xi1> to vector<2x1xi1>
    %57 = vector.shape_cast %56 : vector<2x1xi1> to vector<2x1xi1>
    %58 = vector.broadcast %57 : vector<2x1xi1> to vector<2x32xi1>
    %59 = arith.select %58, %55, %51 : vector<2x32xi1>, vector<2x32xf32>
    %60 = vector.extract_strided_slice %7 {offsets = [12, 0], sizes = [2, 32], strides = [1, 1]} : vector<16x32xf32> to vector<2x32xf32>
    %cst_12 = arith.constant dense<0.000000e+00> : vector<2x32xf32>
    %61 = tpu.matmul %59, %10, %cst_12 {dimension_numbers = #tpu.dot_dimension_numbers<[1], [0], [0], [1], [0, 0, 1, 1], [], []>} : vector<2x32xf32>, vector<32x32xf32>, vector<2x32xf32> -> vector<2x32xf32>
    %62 = arith.addf %60, %61 : vector<2x32xf32>
    %63 = math.tanh %62 : vector<2x32xf32>
    %64 = vector.extract_strided_slice %9 {offsets = [12, 0], sizes = [2, 1], strides = [1, 1]} : vector<16x1xi1> to vector<2x1xi1>
    %65 = vector.shape_cast %64 : vector<2x1xi1> to vector<2x1xi1>
    %66 = vector.broadcast %65 : vector<2x1xi1> to vector<2x32xi1>
    %67 = arith.select %66, %63, %59 : vector<2x32xi1>, vector<2x32xf32>
    %68 = vector.extract_strided_slice %7 {offsets = [14, 0], sizes = [2, 32], strides = [1, 1]} : vector<16x32xf32> to vector<2x32xf32>
    %cst_13 = arith.constant dense<0.000000e+00> : vector<2x32xf32>
    %69 = tpu.matmul %67, %10, %cst_13 {dimension_numbers = #tpu.dot_dimension_numbers<[1], [0], [0], [1], [0, 0, 1, 1], [], []>} : vector<2x32xf32>, vector<32x32xf32>, vector<2x32xf32> -> vector<2x32xf32>
    %70 = arith.addf %68, %69 : vector<2x32xf32>
    %71 = math.tanh %70 : vector<2x32xf32>
    %72 = vector.extract_strided_slice %9 {offsets = [14, 0], sizes = [2, 1], strides = [1, 1]} : vector<16x1xi1> to vector<2x1xi1>
    %73 = vector.shape_cast %72 : vector<2x1xi1> to vector<2x1xi1>
    %74 = vector.broadcast %73 : vector<2x1xi1> to vector<2x32xi1>
    %75 = arith.select %74, %71, %67 : vector<2x32xi1>, vector<2x32xf32>
    %c0_14 = arith.constant 0 : index
    %c0_15 = arith.constant 0 : index
    %76 = vector.load %arg4[%c0_14, %c0_15] : memref<32x128xf32, #tpu.memory_space<vmem>>, vector<32x128xf32>
    %cst_16 = arith.constant dense<0.000000e+00> : vector<2x128xf32>
    %77 = tpu.matmul %75, %76, %cst_16 {dimension_numbers = #tpu.dot_dimension_numbers<[1], [0], [0], [1], [0, 0, 1, 1], [], []>} : vector<2x32xf32>, vector<32x128xf32>, vector<2x128xf32> -> vector<2x128xf32>
    %c0_17 = arith.constant 0 : index
    %c0_18 = arith.constant 0 : index
    %78 = vector.load %arg5[%c0_17, %c0_18] : memref<1x128xf32, #tpu.memory_space<vmem>>, vector<1x128xf32>
    %79 = vector.broadcast %78 : vector<1x128xf32> to vector<2x128xf32>
    %80 = arith.addf %77, %79 : vector<2x128xf32>
    %c0_19 = arith.constant 0 : index
    %c0_20 = arith.constant 0 : index
    %81 = vector.load %arg6[%c0_19, %c0_20] : memref<2x128xf32, #tpu.memory_space<vmem>>, vector<2x128xf32>
    tpu.vector_store %arg6[%c0_19, %c0_20], %80 {strides = array<i32>} : memref<2x128xf32, #tpu.memory_space<vmem>>, vector<2x128xf32>,
    return
  }
  func.func @transform_0(%arg0: i32) -> (i32, i32) {
    %c0_i32 = arith.constant 0 : i32
    %c0_i32_0 = arith.constant 0 : i32
    %c0_i32_1 = arith.constant 0 : i32
    return %c0_i32, %c0_i32_0 : i32, i32
  }
  func.func @transform_1(%arg0: i32) -> (i32, i32) {
    %c0_i32 = arith.constant 0 : i32
    %c0_i32_0 = arith.constant 0 : i32
    %c0_i32_1 = arith.constant 0 : i32
    return %c0_i32, %c0_i32_0 : i32, i32
  }
  func.func @transform_2(%arg0: i32) -> (i32, i32) {
    %c0_i32 = arith.constant 0 : i32
    %c0_i32_0 = arith.constant 0 : i32
    %c0_i32_1 = arith.constant 0 : i32
    return %c0_i32, %c0_i32_0 : i32, i32
  }
  func.func @transform_3(%arg0: i32) -> (i32, i32) {
    %c0_i32 = arith.constant 0 : i32
    %c0_i32_0 = arith.constant 0 : i32
    %c0_i32_1 = arith.constant 0 : i32
    return %c0_i32, %c0_i32_0 : i32, i32
  }
  func.func @transform_4(%arg0: i32) -> (i32, i32) {
    %c0_i32 = arith.constant 0 : i32
    %c0_i32_0 = arith.constant 0 : i32
    %c0_i32_1 = arith.constant 0 : i32
    return %c0_i32, %c0_i32_0 : i32, i32
  }
  func.func @transform_5(%arg0: i32) -> (i32, i32) {
    %c0_i32 = arith.constant 0 : i32
    %c0_i32_0 = arith.constant 0 : i32
    %c0_i32_1 = arith.constant 0 : i32
    return %c0_i32, %c0_i32_0 : i32, i32
  }
}

</mosaic_0001>

<bundles_post_ra>
// kernel: tpu_custom_call.1
= control target key start
LH: loop header
LB: loop body
LE: loop exit
PB: predicated region body
PF: predicated region fallthrough
CT: control target
= control target key end

     0   :  { %10 = vsyncpa [#allocation3], 0  ;;  %s616_s0 = inlined_call_operand.vmem [shape: s32[16,1], index: 0, kind: input, shape index: {}]   ;;  %s617_s1 = inlined_call_operand.vmem [shape: f32[6,32], index: 1, kind: input, shape index: {}]   ;;  %s618_s2 = inlined_call_operand.hbm [shape: f32[32,32], index: 2, kind: input, shape index: {}]   ;;  %s619_s3 = inlined_call_operand.hbm [shape: f32[32,128], index: 3, kind: input, shape index: {}]   ;;  %s620_s4 = inlined_call_operand.vmem [shape: f32[1,128], index: 4, kind: input, shape index: {}]   ;;  %s621_s5 = inlined_call_operand.hbm [shape: f32[2,128], index: 5, kind: output, shape index: {}]  }
   0x1   :  { %11 = vsyncpa [#allocation6], 0 }
   0x2   :  { %12 = vsyncpa [#allocation4], 0  ;;  %s21_s20 = sshll.u32 %s618_s2, 4  ;;  %s533_s21 = smov [#allocation2]   ;;  %s22_s20 = int_to_ptr.hbm [resolvable:$true] %s21_s20 }
   0x3   :  { %s23_s22 = sshll.u32 %s533_s21, 4  ;;  %s34_s25 = sshll.u32 %s619_s3, 4  ;;  %s24_s22 = int_to_ptr.vmem [resolvable:$true] %s23_s22  ;;  %s35_s25 = int_to_ptr.hbm [resolvable:$true] %s34_s25 }
   0x4   :  { %s534_s26 = smov 128   ;;  %s535_s27 = smov 8  }
   0x5   :  { %29 = dma.hbm_to_vmem [thread:$0]  %s22_s20, 512, %s24_s22, [#allocation3], %s534_s26, %s534_s26, %s535_s27  }
   0x6   :  { %s536_s28 = smov [#allocation5]  }
   0x7   :  { %s36_s29 = sshll.u32 %s536_s28, 4  ;;  %s37_s29 = int_to_ptr.vmem [resolvable:$true] %s36_s29 }
   0x8   :  { %42 = dma.hbm_to_vmem [thread:$0]  %s35_s25, 512, %s37_s29, [#allocation6], %s534_s26, %s534_s26, %s535_s27  }
   0x9   :  { %527 = dma.done.wait [#allocation3], 512  }
   0xa   :  { %528 = vsyncadd [#allocation3], 4294966784 }
   0xb   :  { %529 = dma.done.wait [#allocation6], 512  }
   0xc   :  { %530 = vsyncadd [#allocation6], 4294966784  ;;  %v537_v0 = vmov 0   ;;  %v53_v1 = vld [vmem:[%s616_s0] sm:$0xff]  ;;  %v109_v2 = vld [vmem:[#allocation2 + $0x18] sm:$0xff]  ;;  %vm77_vm1 = vcmask 1045504   ;;  %v55_v9 = vlaneseq }
   0xd   :  { %436 = vset.pattern.permute.xlu0 %v537_v0  ;;  %437 = vset.pattern.permute.xlu1 %v537_v0  ;;  %v108_v3 = vld [vmem:[#allocation2 + $0x10] sm:$0xff]  ;;  %v107_v4 = vld [vmem:[#allocation2 + $0x8] sm:$0xff]  ;;  %vm104_vm0 = vcmp.ne.s32.totalorder %v53_v1, 4  ;;  %v69_v6 = vld [vmem:[%s617_s1] sm:$0x3f]  ;;  %v538_v8 = vmov 0.0  }
   0xe   :  { %58 = vperm.xlu0 %436, %v53_v1   ;;  %126 = vmatpush.msra.mxu1 %v109_v2  ;;  %v136_v5 = vsel %vm104_vm0, 1, %v537_v0  ;;  %v106_v7 = vld [vmem:[#allocation2] sm:$0xff]  ;;  %v56_v10 = vand.u32 127, %v55_v9  ;;  %vm70_vm2 = vcmask 48128   ;;  %vm110_vm4 = vcmask 261120   ;;  %v54_v26 = vld [vmem:[%s616_s0 + $0x8] sm:$0xff] }
   0xf   :  { %157 = vmatpush.msra.mxu2 %v109_v2  ;;  %189 = vmatpush.msra.mxu3 %v109_v2  ;;  %vm105_vm6 = vcmp.ne.s32.totalorder %v54_v26, 4  ;;  %v367_v1 = vld [vmem:[#allocation5 + $0x10] sm:$0xff]  ;;  %s539_s9 = smov [#allocation7]   ;;  %s405_s13 = sshll.u32 %s621_s5, 4  ;;  %s406_s13 = int_to_ptr.hbm [resolvable:$true] %s405_s13 }
  0x10   :  { %127 = vmatpush.msra.mxu1 %v108_v3  ;;  %418 = vmatpush.msk.msra.mxu0 %vm77_vm1, %v69_v6  ;;  %v263_v27 = vsel %vm105_vm6, 1, %v537_v0  ;;  %v368_v0 = vld [vmem:[#allocation5 + $0x18] sm:$0xff]  ;;  %s403_s10 = sshll.u32 %s539_s9, 4  ;;  %s404_s10 = int_to_ptr.vmem [resolvable:$true] %s403_s10 }
  0x11   :  { %158 = vmatpush.msra.mxu2 %v108_v3  ;;  %190 = vmatpush.msra.mxu3 %v108_v3 }
  0x12   :  { %128 = vmatpush.msra.mxu1 %v107_v4  ;;  %317 = vmatpush.msrb.mxu0 %v109_v2 }
  0x13   :  { %159 = vmatpush.msra.mxu2 %v107_v4  ;;  %191 = vmatpush.msra.mxu3 %v107_v4 }
  0x14   :  { %129 = vmatpush.msra.mxu1 %v106_v7  ;;  %318 = vmatpush.msrb.mxu0 %v108_v3 }
  0x15   :  { %130 = vmatmul.f32.vlgmr.msra.gmra.mxu1 %v538_v8  ;;  %160 = vmatpush.msra.mxu2 %v106_v7 }
  0x16   :  { %138 = vperm.xlu0 %436, %v136_v5   ;;  %192 = vmatpush.msra.mxu3 %v106_v7 }
  0x17   :  { %221 = vmatpush.msrb.mxu1 %v109_v2  ;;  %253 = vmatpush.msrb.mxu2 %v109_v2 }
  0x18   :  { %285 = vmatpush.msrb.mxu3 %v109_v2  ;;  %319 = vmatpush.msrb.mxu0 %v107_v4 }
  0x19   :  { %222 = vmatpush.msrb.mxu1 %v108_v3  ;;  %254 = vmatpush.msrb.mxu2 %v108_v3 }
  0x1a   :  { %286 = vmatpush.msrb.mxu3 %v108_v3  ;;  %320 = vmatpush.msrb.mxu0 %v106_v7 }
  0x1b   :  { %223 = vmatpush.msrb.mxu1 %v107_v4  ;;  %255 = vmatpush.msrb.mxu2 %v107_v4 }
  0x1c   :  { %287 = vmatpush.msrb.mxu3 %v107_v4  ;;  %61 = vperm.xlu1 %437, %v54_v26  }
  0x1d   :  { %224 = vmatpush.msrb.mxu1 %v106_v7  ;;  %256 = vmatpush.msrb.mxu2 %v106_v7 }
  0x1e   :  { %288 = vmatpush.msrb.mxu3 %v106_v7 }
  0x1f   :  { %349 = vmatpush.msra.mxu1 %v109_v2  ;;  %v366_v2 = vld [vmem:[#allocation5 + $0x8] sm:$0xff] }
  0x21   :  { %350 = vmatpush.msra.mxu1 %v108_v3  ;;  %v365_v3 = vld [vmem:[#allocation5] sm:$0xff] }
  0x23   :  { %351 = vmatpush.msra.mxu1 %v107_v4 }
  0x24   :  { %265 = vperm.xlu1 %437, %v263_v27  }
  0x25   :  { %352 = vmatpush.msra.mxu1 %v106_v7 }
  0x80   :  { %v59_v11 = vpop.permute.xlu0 %58 }
  0x81   :  { %vm63_vm3 = vcmp.eq.s32.totalorder %v59_v11, %v56_v10  ;;  %v438_v11 = vld [vmem:[%s620_s4] ss:$0 sm:$0xff] }
  0x82   :  { %v416_v12 = vsel %vm63_vm3, 1.0, %v538_v8 }
  0x83   :  { %419 = vmatmul.msk.f32.vlgmr.msra.gmra.mxu0 %vm70_vm2, %v416_v12 }
  0x88   :  { %v139_v16 = vpop.permute.xlu0 %138 }
  0x89   :  { %vm140_vm5 = vcmp.eq.s32.totalorder %v139_v16, 1 }
  0x8e   :  { %v62_v35 = vpop.permute.xlu1 %61 }
  0x8f   :  { %vm64_vm7 = vcmp.eq.s32.totalorder %v62_v35, %v56_v10 }
  0x90   :  { %v417_v36 = vsel %vm64_vm7, 1.0, %v538_v8 }
  0x91   :  { %420 = vmatmul.msk.f32.gmra.mxu0 %vm70_vm2, %v417_v36 }
  0x92   :  { %v131_v13 = vpop.f32.mrf.mxu1 }
  0x96   :  { %v266_v47 = vpop.permute.xlu1 %265 }
  0x97   :  { %vm267_vm8 = vcmp.eq.s32.totalorder %v266_v47, 1 }
 0x100   :  { %v98_v14 = vpop.f32.mrf.mxu0 }
 0x101   :  { %v134_v15 = vadd.f32 %v131_v13, %v98_v14 }
 0x103   :  { %439 = vtanh.f32 %v134_v15 }
 0x109   :  { %v440_v17 = vpop.eup %439 }
 0x10a   :  { %v141_v18 = vsel %vm140_vm5, %v440_v17, 0.0 }
 0x10b   :  { %421 = vmatmul.msk.f32.vlgmr.msra.gmra.mxu2 %vm110_vm4, %v141_v18  ;;  %v170_v22 = vrot.slane %v141_v18, 6 }
 0x10c   :  { %389 = vmatpush.msra.mxu2 %v368_v0 }
 0x10e   :  { %v101_v44 = vpop.f32.mrf.mxu0  ;;  %390 = vmatpush.msra.mxu2 %v367_v1 }
 0x110   :  { %391 = vmatpush.msra.mxu2 %v366_v2 }
 0x112   :  { %392 = vmatpush.msra.mxu2 %v365_v3 }
 0x18e   :  { %v162_v19 = vpop.f32.mrf.mxu2 }
 0x18f   :  { %v166_v20 = vrot.slane %v162_v19, 6 }
 0x191   :  { %v168_v21 = vadd.f32 %v166_v20, %v98_v14 }
 0x193   :  { %441 = vtanh.f32 %v168_v21 }
 0x199   :  { %v442_v23 = vpop.eup %441 }
 0x19a   :  { %v172_v24 = vsel %vm140_vm5, %v442_v23, %v170_v22 }
 0x19b   :  { %v174_v25 = vrot.slane %v172_v24, 2  ;;  %v202_v31 = vrot.slane %v172_v24, 6 }
 0x19d   :  { %422 = vmatmul.msk.f32.vlgmr.msra.gmra.mxu3 %vm110_vm4, %v174_v25 }
 0x220   :  { %v194_v28 = vpop.f32.mrf.mxu3 }
 0x221   :  { %v198_v29 = vrot.slane %v194_v28, 4 }
 0x223   :  { %v200_v30 = vadd.f32 %v198_v29, %v98_v14 }
 0x225   :  { %443 = vtanh.f32 %v200_v30 }
 0x22b   :  { %v444_v32 = vpop.eup %443 }
 0x22c   :  { %v204_v33 = vsel %vm140_vm5, %v444_v32, %v202_v31 }
 0x22d   :  { %v206_v34 = vrot.slane %v204_v33, 4  ;;  %v234_v40 = vrot.slane %v204_v33, 6 }
 0x22f   :  { %423 = vmatmul.msk.f32.vlgmr.msrb.gmra.mxu1 %vm110_vm4, %v206_v34 }
 0x2ac   :  { %v226_v37 = vpop.f32.mrf.mxu1 }
 0x2ad   :  { %v230_v38 = vrot.slane %v226_v37, 2 }
 0x2af   :  { %v232_v39 = vadd.f32 %v230_v38, %v98_v14 }
 0x2b1   :  { %445 = vtanh.f32 %v232_v39 }
 0x2b7   :  { %v446_v41 = vpop.eup %445 }
 0x2b8   :  { %v236_v42 = vsel %vm140_vm5, %v446_v41, %v234_v40 }
 0x2b9   :  { %v238_v43 = vrot.slane %v236_v42, 6 }
 0x2bb   :  { %424 = vmatmul.msk.f32.vlgmr.msrb.gmra.mxu2 %vm110_vm4, %v238_v43 }
 0x33e   :  { %v258_v45 = vpop.f32.mrf.mxu2 }
 0x33f   :  { %v261_v46 = vadd.f32 %v258_v45, %v101_v44 }
 0x341   :  { %447 = vtanh.f32 %v261_v46 }
 0x347   :  { %v448_v48 = vpop.eup %447 }
 0x348   :  { %v269_v49 = vsel %vm267_vm8, %v448_v48, %v238_v43 }
 0x349   :  { %425 = vmatmul.msk.f32.vlgmr.msrb.gmra.mxu3 %vm110_vm4, %v269_v49  ;;  %v298_v53 = vrot.slane %v269_v49, 6 }
 0x3cc   :  { %v290_v50 = vpop.f32.mrf.mxu3 }
 0x3cd   :  { %v294_v51 = vrot.slane %v290_v50, 6 }
 0x3cf   :  { %v296_v52 = vadd.f32 %v294_v51, %v101_v44 }
 0x3d1   :  { %449 = vtanh.f32 %v296_v52 }
 0x3d7   :  { %v450_v54 = vpop.eup %449 }
 0x3d8   :  { %v300_v55 = vsel %vm267_vm8, %v450_v54, %v298_v53 }
 0x3d9   :  { %v302_v56 = vrot.slane %v300_v55, 2  ;;  %v330_v60 = vrot.slane %v300_v55, 6 }
 0x3db   :  { %426 = vmatmul.msk.f32.vlgmr.msrb.gmra.mxu0 %vm110_vm4, %v302_v56 }
 0x458   :  { %v322_v57 = vpop.f32.mrf.mxu0 }
 0x459   :  { %v326_v58 = vrot.slane %v322_v57, 4 }
 0x45b   :  { %v328_v59 = vadd.f32 %v326_v58, %v101_v44 }
 0x45d   :  { %451 = vtanh.f32 %v328_v59 }
 0x463   :  { %v452_v61 = vpop.eup %451 }
 0x464   :  { %v332_v62 = vsel %vm267_vm8, %v452_v61, %v330_v60 }
 0x465   :  { %v334_v63 = vrot.slane %v332_v62, 4  ;;  %v362_v7 = vrot.slane %v332_v62, 6 }
 0x467   :  { %427 = vmatmul.msk.f32.vlgmr.msra.gmra.mxu1 %vm110_vm4, %v334_v63 }
 0x4e4   :  { %v354_v4 = vpop.f32.mrf.mxu1 }
 0x4e5   :  { %v358_v5 = vrot.slane %v354_v4, 2 }
 0x4e7   :  { %v360_v6 = vadd.f32 %v358_v5, %v101_v44 }
 0x4e9   :  { %453 = vtanh.f32 %v360_v6 }
 0x4ef   :  { %v454_v8 = vpop.eup %453 }
 0x4f0   :  { %v364_v9 = vsel %vm267_vm8, %v454_v8, %v362_v7 }
 0x4f1   :  { %v374_v10 = vrot.slane %v364_v9, 6 }
 0x4f3   :  { %428 = vmatmul.msk.f32.vlgmr.msra.gmra.mxu2 %vm110_vm4, %v374_v10 }
 0x576   :  { %v394_v12 = vpop.f32.mrf.mxu2 }
 0x577   :  { %v395_v13 = vadd.f32 %v438_v11, %v394_v12 }
 0x579   :  { %397 = vst [vmem:[#allocation7] sm:$0x3] %v395_v13 }
 0x57a   :  { %408 = dma.vmem_to_hbm [thread:$0]  %s404_s10, 32, %s406_s13, [#allocation4]  }
 0x57b   :  { %531 = dma.done.wait [#allocation4], 32  }
 0x57c   :  { %532 = vsyncadd [#allocation4], 4294967264 }
 0x57d   :  { %413 = vsyncpa [#allocation3], 1 }
 0x57e   :  { %414 = vsyncpa [#allocation6], 1 }
 0x57f   :  { %415 = vsyncpa [#allocation4], 1 }

</bundles_post_ra>
